<compile_context>
chip_gen: v5e
topology: v5e:2x2
jax: 0.10.0
libtpu: 0.0.40
codegen_flags: <defaults>
</compile_context>

<pallas_src>
import jax
import jax.numpy as jnp
from jax.experimental import pallas as pl
from jax.experimental.pallas import tpu as pltpu

BN_EPS = 1e-5


def _vmem_limit_bytes():
    """Per-generation VMEM budget (v7x: 64 MiB/TC -> ~48 MiB; v5e/v6e: 128 MiB
    physical, default scoped limit is much lower so raise it explicitly)."""
    cap = 64 * 1024 * 1024
    try:
        cap = int(getattr(pltpu.get_tpu_info(), "vmem_capacity_bytes", cap))
    except Exception:
        pass
    return min((cap * 3) // 4, 96 * 1024 * 1024)


# --------------------------------------------------------------------------- #
# Banded conv weights: fold the 3 dx taps + left/right zero pad into K
# --------------------------------------------------------------------------- #
def banded_conv_weights(w_taps, W):
    """w_taps: (9, Cin, Cout) f32, tap index t = dy*3 + dx.
    Returns (3, W*Cin, W*Cout) bf16 banded matrices BW such that for a
    row-zero-padded, lane-flattened input x_rows (H+2, W*Cin):
        out[h, w*Cout + o] = sum_dy  x_rows[h + dy, :] @ BW[dy]
    i.e. the dx shifts and the spatial left/right padding are encoded in the
    band structure, so the kernel needs no column padding or lane shifts."""
    _, Cin, Cout = w_taps.shape
    eye = jnp.eye(W, dtype=w_taps.dtype)
    bw = jnp.zeros((3, W * Cin, W * Cout), w_taps.dtype)
    for dy in range(3):
        for dx in range(3):
            blk = jnp.kron(eye, w_taps[dy * 3 + dx])       # (W*Cin, W*Cout)
            if dx == 1:                                     # same column
                bw = bw.at[dy].add(blk)
            elif dx == 2:                                   # input col w+1
                bw = bw.at[dy, Cin:, :].add(blk[:-Cin, :])
            else:                                           # dx == 0: col w-1
                bw = bw.at[dy, :-Cin, :].add(blk[Cin:, :])
    return bw.astype(jnp.bfloat16)


# --------------------------------------------------------------------------- #
# Pallas kernel: 3x3 conv (banded matmuls) + packed BN partial stats
# --------------------------------------------------------------------------- #
def _make_conv_kernel(n_inputs, H, W, Cout, fold_bn_relu):
    """Refs (in order):
      x_refs[n_inputs] : (1, H+2, W*Cin_i) bf16 row-padded lane-flat inputs,
                         or (1, H, W*Cin_i) when fold_bn_relu (rows added here)
      [scale, shift]   : (1, 1, W*Cin) f32  (only if fold_bn_relu)
      w_refs[n_inputs] : (3, W*Cin_i, W*Cout) bf16 banded weights
      o_ref            : (1, H, W*Cout)   raw conv output (no BN), lane-dense
      stat_ref         : (1, 2, W*Cout) f32  [row-sum ; row-sum-of-squares]
    """

    def kernel(*refs):
        i = 0
        x_refs = refs[i:i + n_inputs]
        i += n_inputs
        if fold_bn_relu:
            scale_ref, shift_ref = refs[i], refs[i + 1]
            i += 2
        w_refs = refs[i:i + n_inputs]
        i += n_inputs
        o_ref, stat_ref = refs[i], refs[i + 1]

        acc = None
        for x_ref, w_ref in zip(x_refs, w_refs):
            if fold_bn_relu:
                # Previous stage's BN + ReLU folded into this load (f32 math),
                # applied to the interior rows only; the two halo rows appended
                # afterwards are exact zeros (matches conv zero padding).
                xv = x_ref[0].astype(jnp.float32)                  # (H, W*Cin)
                xv = jnp.maximum(xv * scale_ref[0] + shift_ref[0], 0.0)
                zr = jnp.zeros((1, xv.shape[-1]), jnp.float32)
                x = jnp.concatenate([zr, xv, zr], axis=0).astype(jnp.bfloat16)
            else:
                x = x_ref[0]                                       # (H+2, W*Cin)
            for dy in range(3):
                d = jnp.dot(x[dy:dy + H, :], w_ref[dy],
                            preferred_element_type=jnp.float32)
                acc = d if acc is None else acc + d                # (H, W*Cout)

        # Lane-dense store of the raw conv output (conv bias omitted: exactly
        # cancelled by the training-mode BN mean subtraction).
        o_ref[...] = acc.astype(o_ref.dtype).reshape(1, H, W * Cout)

        # Packed, lane-dense BN partial statistics (per (w, cout) column);
        # the tiny cross-batch / cross-w reduction happens in JAX outside.
        stats = jnp.concatenate(
            [jnp.sum(acc, axis=0, keepdims=True),
             jnp.sum(acc * acc, axis=0, keepdims=True)], axis=0)
        stat_ref[...] = stats.reshape(1, 2, W * Cout)

    return kernel


def conv3x3_bn_stats_pass(x_list, bw_list, *, H, W, Cout,
                          in_scale=None, in_shift=None,
                          out_dtype=jnp.bfloat16):
    """3x3 conv (padding=1) over the channel-concat of `x_list` without ever
    materializing the concat (weights are split along Cin instead).
    x_list entries: (N, H+2, W*Cin_i) bf16 row-padded, or (N, H, W*Cin_i) when
    in_scale/in_shift are given (previous stage's BN+ReLU + row pad applied
    in-kernel).  Returns (raw_out (N, H, W*Cout), sum (Cout,), sumsq (Cout,)).
    """
    N = x_list[0].shape[0]
    fold = in_scale is not None
    kernel = _make_conv_kernel(len(x_list), H, W, Cout, fold)

    in_specs, operands = [], []
    for x in x_list:
        in_specs.append(pl.BlockSpec((1,) + x.shape[1:], lambda n: (n, 0, 0)))
        operands.append(x)
    if fold:
        wc = x_list[0].shape[-1]
        for v in (in_scale, in_shift):
            in_specs.append(pl.BlockSpec((1, 1, wc), lambda n: (0, 0, 0)))
            operands.append(jnp.tile(v.astype(jnp.float32), W).reshape(1, 1, wc))
    for bw in bw_list:
        in_specs.append(pl.BlockSpec(bw.shape, lambda n: (0, 0, 0)))
        operands.append(bw)

    out_shape = (jax.ShapeDtypeStruct((N, H, W * Cout), out_dtype),
                 jax.ShapeDtypeStruct((N, 2, W * Cout), jnp.float32))
    out_specs = (pl.BlockSpec((1, H, W * Cout), lambda n: (n, 0, 0)),
                 pl.BlockSpec((1, 2, W * Cout), lambda n: (n, 0, 0)))

    y_raw, stats = pl.pallas_call(
        kernel,
        grid=(N,),
        in_specs=in_specs,
        out_specs=out_specs,
        out_shape=out_shape,
        compiler_params=pltpu.CompilerParams(
            dimension_semantics=("parallel",),
            vmem_limit_bytes=_vmem_limit_bytes()),
    )(*operands)

    # One-pass sum / sumsq in f32 (fine at these scales; Welford-style merge
    # would be needed if activation means dwarf their std).
    s = stats[:, 0, :].reshape(N, W, Cout).sum(axis=(0, 1))
    q = stats[:, 1, :].reshape(N, W, Cout).sum(axis=(0, 1))
    return y_raw, s, q


# --------------------------------------------------------------------------- #
# Pallas kernel: final BN + ReLU (lane-dense, full-image blocks)
# --------------------------------------------------------------------------- #
def _bn_relu_kernel(x_ref, scale_ref, shift_ref, o_ref):
    x = x_ref[...].astype(jnp.float32)
    o_ref[...] = jnp.maximum(x * scale_ref[...] + shift_ref[...], 0.0)


def bn_relu_pass(y_raw, scale, shift, *, width):
    """y_raw: (N, H, W*C) raw conv output; applies per-channel y*scale+shift
    then ReLU on full-image (1, H, W*C) lane-dense blocks."""
    N, H, WC = y_raw.shape
    scale_t = jnp.tile(scale, width).reshape(1, 1, WC).astype(jnp.float32)
    shift_t = jnp.tile(shift, width).reshape(1, 1, WC).astype(jnp.float32)
    return pl.pallas_call(
        _bn_relu_kernel,
        grid=(N,),
        in_specs=[pl.BlockSpec((1, H, WC), lambda n: (n, 0, 0)),
                  pl.BlockSpec((1, 1, WC), lambda n: (0, 0, 0)),
                  pl.BlockSpec((1, 1, WC), lambda n: (0, 0, 0))],
        out_specs=pl.BlockSpec((1, H, WC), lambda n: (n, 0, 0)),
        out_shape=jax.ShapeDtypeStruct((N, H, WC), jnp.float32),
        compiler_params=pltpu.CompilerParams(
            dimension_semantics=("parallel",),
            vmem_limit_bytes=_vmem_limit_bytes()),
    )(y_raw, scale_t, shift_t)


def _bn_scale_shift(psum, psq, count, gamma, beta, eps=BN_EPS):
    mean = psum / count
    var = psq / count - mean * mean       # biased (training-mode) variance
    scale = gamma * jax.lax.rsqrt(var + eps)
    return scale, beta - mean * scale


# --------------------------------------------------------------------------- #
# Glue: bilinear x2 upsample (align_corners=True)  (plain JAX)
# --------------------------------------------------------------------------- #
def bilinear_up2x_align_corners(x):
    """x: (N, H, W, C) -> (N, 2H, 2W, C); matches
    nn.Upsample(scale_factor=2, mode='bilinear', align_corners=True)."""
    N, H, W, C = x.shape
    oh, ow = 2 * H, 2 * W

    def grid(in_size, out_size):
        if in_size == 1 or out_size == 1:
            z = jnp.zeros((out_size,), jnp.int32)
            return z, z, jnp.zeros((out_size,), jnp.float32)
        s = jnp.arange(out_size, dtype=jnp.float32) * (
            (in_size - 1) / (out_size - 1))
        i0 = jnp.floor(s).astype(jnp.int32)
        i1 = jnp.minimum(i0 + 1, in_size - 1)
        return i0, i1, s - i0.astype(jnp.float32)

    y0, y1, wy = grid(H, oh)
    x0, x1, wx = grid(W, ow)
    wy = wy[None, :, None, None]
    wx = wx[None, None, :, None]
    r0, r1 = x[:, y0], x[:, y1]
    top = r0[:, :, x0] * (1.0 - wx) + r0[:, :, x1] * wx
    bot = r1[:, :, x0] * (1.0 - wx) + r1[:, :, x1] * wx
    return top * (1.0 - wy) + bot * wy


# --------------------------------------------------------------------------- #
# Public forward: Up(in_channels, out_channels, skip_channels, 'bilinear')
# --------------------------------------------------------------------------- #
def up_forward(x1_nchw, x2_nchw, p):
    """NCHW in / NCHW out, matching the PyTorch module's forward.
    BatchNorm uses batch statistics (PyTorch training-mode default)."""
    # TODO(synk): bilinear upsample + NCHW<->NHWC transposes stay as XLA glue;
    # for large H a row-tiled variant (pl.ANY + manual halo DMA) would be
    # needed to fit v7x's 64 MiB VMEM -- not required at these sizes.
    x1 = jnp.transpose(x1_nchw, (0, 2, 3, 1))  # -> NHWC
    x2 = jnp.transpose(x2_nchw, (0, 2, 3, 1))

    x1 = bilinear_up2x_align_corners(x1)
    diffY = x2.shape[1] - x1.shape[1]
    diffX = x2.shape[2] - x1.shape[2]
    x1 = jnp.pad(x1, ((0, 0),
                      (diffY // 2, diffY - diffY // 2),
                      (diffX // 2, diffX - diffX // 2),
                      (0, 0)))

    N, H, W, Cs = x2.shape
    Cmid = p["w1"].shape[-1]
    Cout = p["w2"].shape[-1]
    count = N * H * W

    def rows(x):  # (N,H,W,C) -> (N, H+2, W*C): pad 2 zero rows once, bf16
        n, h, w, c = x.shape
        return jnp.pad(x.reshape(n, h, w * c),
                       ((0, 0), (1, 1), (0, 0))).astype(jnp.bfloat16)

    # Stage 1: conv over cat([x2, x1]) -- concat never materialized; the banded
    # weights are split along Cin instead ([x2 channels | x1 channels]).
    bw1_skip = banded_conv_weights(p["w1"][:, :Cs, :], W)
    bw1_up = banded_conv_weights(p["w1"][:, Cs:, :], W)
    y1_raw, s1, q1 = conv3x3_bn_stats_pass(
        [rows(x2), rows(x1)], [bw1_skip, bw1_up], H=H, W=W, Cout=Cmid)
    scale1, shift1 = _bn_scale_shift(s1, q1, count, p["g1"], p["be1"])

    # Stage 2: conv, with stage 1's BN + ReLU folded into the input load.
    bw2 = banded_conv_weights(p["w2"], W)
    y2_raw, s2, q2 = conv3x3_bn_stats_pass(
        [y1_raw], [bw2], H=H, W=W, Cout=Cout,
        in_scale=scale1, in_shift=shift1)
    scale2, shift2 = _bn_scale_shift(s2, q2, count, p["g2"], p["be2"])

    # Final BN + ReLU (lane-dense elementwise pass), then back to NCHW.
    y = bn_relu_pass(y2_raw, scale2, shift2, width=W)
    return jnp.transpose(y.reshape(N, H, W, Cout), (0, 3, 1, 2))


# --------------------------------------------------------------------------- #
# Pure-JAX f32 reference (NCHW, lax.conv, with conv bias) for correctness
# --------------------------------------------------------------------------- #
def ref_forward(x1_nchw, x2_nchw, p):
    def up(x):
        xh = jnp.transpose(x, (0, 2, 3, 1))
        return jnp.transpose(bilinear_up2x_align_corners(xh), (0, 3, 1, 2))

    x1 = up(x1_nchw)
    diffY = x2_nchw.shape[2] - x1.shape[2]
    diffX = x2_nchw.shape[3] - x1.shape[3]
    x1 = jnp.pad(x1, ((0, 0), (0, 0),
                      (diffY // 2, diffY - diffY // 2),
                      (diffX // 2, diffX - diffX // 2)))
    x = jnp.concatenate([x2_nchw, x1], axis=1)

    def cbr(x, w_oihw, b, g, be):
        y = jax.lax.conv_general_dilated(
            x, w_oihw, (1, 1), ((1, 1), (1, 1)),
            dimension_numbers=("NCHW", "OIHW", "NCHW"))
        y = y + b[None, :, None, None]
        mean = jnp.mean(y, axis=(0, 2, 3), keepdims=True)
        var = jnp.mean((y - mean) ** 2, axis=(0, 2, 3), keepdims=True)
        y = (y - mean) * (g[None, :, None, None] * jax.lax.rsqrt(var + BN_EPS)) \
            + be[None, :, None, None]
        return jnp.maximum(y, 0.0)

    y = cbr(x, p["w1_oihw"], p["b1"], p["g1"], p["be1"])
    y = cbr(y, p["w2_oihw"], p["b2"], p["g2"], p["be2"])
    return y


def oihw_to_9io(w):  # (Cout, Cin, 3, 3) -> (9, Cin, Cout), tap index = dy*3+dx
    Cout, Cin = w.shape[0], w.shape[1]
    return jnp.transpose(w, (2, 3, 1, 0)).reshape(9, Cin, Cout)


# --------------------------------------------------------------------------- #
if __name__ == "__main__":
    key = jax.random.PRNGKey(0)
    ks = jax.random.split(key, 10)

    # Up(in_channels=4, out_channels=8, skip_channels=4, 'bilinear')
    N = 2
    in_channels, skip_channels, out_channels = 4, 4, 8
    H1 = W1 = 8    # low-res feature map (x1)
    H2 = W2 = 16   # skip-connection feature map (x2)

    x1 = jax.random.normal(ks[0], (N, in_channels, H1, W1), jnp.float32)
    x2 = jax.random.normal(ks[1], (N, skip_channels, H2, W2), jnp.float32)

    cat_ch = in_channels + skip_channels   # 8
    mid_ch = out_channels                  # DoubleConv mid = out

    # Deterministic synthetic parameters (PyTorch conv weight layout OIHW).
    w1_oihw = jax.random.normal(ks[2], (mid_ch, cat_ch, 3, 3), jnp.float32) * 0.1
    b1 = jax.random.normal(ks[3], (mid_ch,), jnp.float32) * 0.1
    w2_oihw = jax.random.normal(ks[4], (out_channels, mid_ch, 3, 3),
                                jnp.float32) * 0.1
    b2 = jax.random.normal(ks[5], (out_channels,), jnp.float32) * 0.1
    g1 = 1.0 + 0.1 * jax.random.normal(ks[6], (mid_ch,), jnp.float32)
    be1 = 0.1 * jax.random.normal(ks[7], (mid_ch,), jnp.float32)
    g2 = 1.0 + 0.1 * jax.random.normal(ks[8], (out_channels,), jnp.float32)
    be2 = 0.1 * jax.random.normal(ks[9], (out_channels,), jnp.float32)

    params = {
        "w1": oihw_to_9io(w1_oihw), "w1_oihw": w1_oihw, "b1": b1,
        "g1": g1, "be1": be1,
        "w2": oihw_to_9io(w2_oihw), "w2_oihw": w2_oihw, "b2": b2,
        "g2": g2, "be2": be2,
    }

    fwd = jax.jit(up_forward)
    out = jax.block_until_ready(fwd(x1, x2, params))
    assert out.shape == (N, out_channels, H2, W2), out.shape

    ref = jax.block_until_ready(ref_forward(x1, x2, params))
    # Kernels use bf16 MXU operands and a bf16 intermediate (stats / epilogue
    # in f32); the reference is pure f32, hence the tolerance.
    err = float(jnp.max(jnp.abs(out - ref)))
    assert jnp.allclose(out, ref, atol=5e-2, rtol=5e-2), err

    print("KERNEL_OK")
</pallas_src>

<mosaic_0001>
module attributes {stable_mosaic.version = 11 : i64} {
  func.func @kernel(%arg0: i32, %arg1: memref<1x18x64xbf16, #tpu.memory_space<vmem>>, %arg2: memref<1x18x64xbf16, #tpu.memory_space<vmem>>, %arg3: memref<3x64x128xbf16, #tpu.memory_space<vmem>>, %arg4: memref<3x64x128xbf16, #tpu.memory_space<vmem>>, %arg5: memref<1x16x128xbf16, #tpu.memory_space<vmem>>, %arg6: memref<1x2x128xf32, #tpu.memory_space<vmem>>) attributes {dimension_semantics = [#tpu.dimension_semantics<parallel>], iteration_bounds = array<i64: 2>, scalar_prefetch = 0 : i64, scratch_operands = 0 : i64, tpu.core_type = #tpu.core_type<tc>, window_params = [{transform_indices = @transform_0, window_bounds = array<i64: 1, 18, 64>}, {transform_indices = @transform_1, window_bounds = array<i64: 1, 18, 64>}, {pipeline_mode = #tpu.pipeline_mode<synchronous>, transform_indices = @transform_2, window_bounds = array<i64: 3, 64, 128>}, {pipeline_mode = #tpu.pipeline_mode<synchronous>, transform_indices = @transform_3, window_bounds = array<i64: 3, 64, 128>}, {transform_indices = @transform_4, window_bounds = array<i64: 1, 16, 128>}, {transform_indices = @transform_5, window_bounds = array<i64: 1, 2, 128>}]} {
    %c0 = arith.constant 0 : index
    %c0_0 = arith.constant 0 : index
    %c0_1 = arith.constant 0 : index
    %0 = vector.load %arg1[%c0, %c0_0, %c0_1] : memref<1x18x64xbf16, #tpu.memory_space<vmem>>, vector<1x18x64xbf16>
    %1 = vector.shape_cast %0 : vector<1x18x64xbf16> to vector<18x64xbf16>
    %2 = vector.extract_strided_slice %1 {offsets = [0, 0], sizes = [16, 64], strides = [1, 1]} : vector<18x64xbf16> to vector<16x64xbf16>
    %c0_2 = arith.constant 0 : index
    %c0_3 = arith.constant 0 : index
    %c0_4 = arith.constant 0 : index
    %3 = vector.load %arg3[%c0_2, %c0_3, %c0_4] : memref<3x64x128xbf16, #tpu.memory_space<vmem>>, vector<1x64x128xbf16>
    %4 = vector.shape_cast %3 : vector<1x64x128xbf16> to vector<64x128xbf16>
    %cst = arith.constant dense<0.000000e+00> : vector<16x128xf32>
    %5 = tpu.matmul %2, %4, %cst {dimension_numbers = #tpu.dot_dimension_numbers<[1], [0], [0], [1], [0, 0, 1, 1], [], []>} : vector<16x64xbf16>, vector<64x128xbf16>, vector<16x128xf32> -> vector<16x128xf32>
    %6 = vector.extract_strided_slice %1 {offsets = [1, 0], sizes = [16, 64], strides = [1, 1]} : vector<18x64xbf16> to vector<16x64xbf16>
    %c1 = arith.constant 1 : index
    %c0_5 = arith.constant 0 : index
    %c0_6 = arith.constant 0 : index
    %7 = vector.load %arg3[%c1, %c0_5, %c0_6] : memref<3x64x128xbf16, #tpu.memory_space<vmem>>, vector<1x64x128xbf16>
    %8 = vector.shape_cast %7 : vector<1x64x128xbf16> to vector<64x128xbf16>
    %cst_7 = arith.constant dense<0.000000e+00> : vector<16x128xf32>
    %9 = tpu.matmul %6, %8, %cst_7 {dimension_numbers = #tpu.dot_dimension_numbers<[1], [0], [0], [1], [0, 0, 1, 1], [], []>} : vector<16x64xbf16>, vector<64x128xbf16>, vector<16x128xf32> -> vector<16x128xf32>
    %10 = arith.addf %5, %9 : vector<16x128xf32>
    %11 = vector.extract_strided_slice %1 {offsets = [2, 0], sizes = [16, 64], strides = [1, 1]} : vector<18x64xbf16> to vector<16x64xbf16>
    %c2 = arith.constant 2 : index
    %c0_8 = arith.constant 0 : index
    %c0_9 = arith.constant 0 : index
    %12 = vector.load %arg3[%c2, %c0_8, %c0_9] : memref<3x64x128xbf16, #tpu.memory_space<vmem>>, vector<1x64x128xbf16>
    %13 = vector.shape_cast %12 : vector<1x64x128xbf16> to vector<64x128xbf16>
    %cst_10 = arith.constant dense<0.000000e+00> : vector<16x128xf32>
    %14 = tpu.matmul %11, %13, %cst_10 {dimension_numbers = #tpu.dot_dimension_numbers<[1], [0], [0], [1], [0, 0, 1, 1], [], []>} : vector<16x64xbf16>, vector<64x128xbf16>, vector<16x128xf32> -> vector<16x128xf32>
    %15 = arith.addf %10, %14 : vector<16x128xf32>
    %c0_11 = arith.constant 0 : index
    %c0_12 = arith.constant 0 : index
    %c0_13 = arith.constant 0 : index
    %16 = vector.load %arg2[%c0_11, %c0_12, %c0_13] : memref<1x18x64xbf16, #tpu.memory_space<vmem>>, vector<1x18x64xbf16>
    %17 = vector.shape_cast %16 : vector<1x18x64xbf16> to vector<18x64xbf16>
    %18 = vector.extract_strided_slice %17 {offsets = [0, 0], sizes = [16, 64], strides = [1, 1]} : vector<18x64xbf16> to vector<16x64xbf16>
    %c0_14 = arith.constant 0 : index
    %c0_15 = arith.constant 0 : index
    %c0_16 = arith.constant 0 : index
    %19 = vector.load %arg4[%c0_14, %c0_15, %c0_16] : memref<3x64x128xbf16, #tpu.memory_space<vmem>>, vector<1x64x128xbf16>
    %20 = vector.shape_cast %19 : vector<1x64x128xbf16> to vector<64x128xbf16>
    %cst_17 = arith.constant dense<0.000000e+00> : vector<16x128xf32>
    %21 = tpu.matmul %18, %20, %cst_17 {dimension_numbers = #tpu.dot_dimension_numbers<[1], [0], [0], [1], [0, 0, 1, 1], [], []>} : vector<16x64xbf16>, vector<64x128xbf16>, vector<16x128xf32> -> vector<16x128xf32>
    %22 = arith.addf %15, %21 : vector<16x128xf32>
    %23 = vector.extract_strided_slice %17 {offsets = [1, 0], sizes = [16, 64], strides = [1, 1]} : vector<18x64xbf16> to vector<16x64xbf16>
    %c1_18 = arith.constant 1 : index
    %c0_19 = arith.constant 0 : index
    %c0_20 = arith.constant 0 : index
    %24 = vector.load %arg4[%c1_18, %c0_19, %c0_20] : memref<3x64x128xbf16, #tpu.memory_space<vmem>>, vector<1x64x128xbf16>
    %25 = vector.shape_cast %24 : vector<1x64x128xbf16> to vector<64x128xbf16>
    %cst_21 = arith.constant dense<0.000000e+00> : vector<16x128xf32>
    %26 = tpu.matmul %23, %25, %cst_21 {dimension_numbers = #tpu.dot_dimension_numbers<[1], [0], [0], [1], [0, 0, 1, 1], [], []>} : vector<16x64xbf16>, vector<64x128xbf16>, vector<16x128xf32> -> vector<16x128xf32>
    %27 = arith.addf %22, %26 : vector<16x128xf32>
    %28 = vector.extract_strided_slice %17 {offsets = [2, 0], sizes = [16, 64], strides = [1, 1]} : vector<18x64xbf16> to vector<16x64xbf16>
    %c2_22 = arith.constant 2 : index
    %c0_23 = arith.constant 0 : index
    %c0_24 = arith.constant 0 : index
    %29 = vector.load %arg4[%c2_22, %c0_23, %c0_24] : memref<3x64x128xbf16, #tpu.memory_space<vmem>>, vector<1x64x128xbf16>
    %30 = vector.shape_cast %29 : vector<1x64x128xbf16> to vector<64x128xbf16>
    %cst_25 = arith.constant dense<0.000000e+00> : vector<16x128xf32>
    %31 = tpu.matmul %28, %30, %cst_25 {dimension_numbers = #tpu.dot_dimension_numbers<[1], [0], [0], [1], [0, 0, 1, 1], [], []>} : vector<16x64xbf16>, vector<64x128xbf16>, vector<16x128xf32> -> vector<16x128xf32>
    %32 = arith.addf %27, %31 : vector<16x128xf32>
    %33 = arith.truncf %32 : vector<16x128xf32> to vector<16x128xbf16>
    %34 = vector.shape_cast %33 : vector<16x128xbf16> to vector<1x16x128xbf16>
    %c0_26 = arith.constant 0 : index
    %c0_27 = arith.constant 0 : index
    %c0_28 = arith.constant 0 : index
    %35 = vector.load %arg5[%c0_26, %c0_27, %c0_28] : memref<1x16x128xbf16, #tpu.memory_space<vmem>>, vector<1x16x128xbf16>
    tpu.vector_store %arg5[%c0_26, %c0_27, %c0_28], %34 {strides = array<i32>} : memref<1x16x128xbf16, #tpu.memory_space<vmem>>, vector<1x16x128xbf16>,
    %cst_29 = arith.constant dense<0.000000e+00> : vector<128xf32>
    %36 = vector.multi_reduction <add>, %32, %cst_29 [0] : vector<16x128xf32> to vector<128xf32>
    %37 = vector.shape_cast %36 : vector<128xf32> to vector<1x128xf32>
    %38 = arith.mulf %32, %32 : vector<16x128xf32>
    %cst_30 = arith.constant dense<0.000000e+00> : vector<128xf32>
    %39 = vector.multi_reduction <add>, %38, %cst_30 [0] : vector<16x128xf32> to vector<128xf32>
    %40 = vector.shape_cast %39 : vector<128xf32> to vector<1x128xf32>
    %41 = tpu.concatenate %37, %40 in 0 : vector<1x128xf32>, vector<1x128xf32> -> vector<2x128xf32>
    %42 = vector.shape_cast %41 : vector<2x128xf32> to vector<1x2x128xf32>
    %c0_31 = arith.constant 0 : index
    %c0_32 = arith.constant 0 : index
    %c0_33 = arith.constant 0 : index
    %43 = vector.load %arg6[%c0_31, %c0_32, %c0_33] : memref<1x2x128xf32, #tpu.memory_space<vmem>>, vector<1x2x128xf32>
    tpu.vector_store %arg6[%c0_31, %c0_32, %c0_33], %42 {strides = array<i32>} : memref<1x2x128xf32, #tpu.memory_space<vmem>>, vector<1x2x128xf32>,
    return
  }
  func.func @transform_0(%arg0: i32) -> (i32, i32, i32) {
    %c0_i32 = arith.constant 0 : i32
    %c0_i32_0 = arith.constant 0 : i32
    %c0_i32_1 = arith.constant 0 : i32
    return %arg0, %c0_i32, %c0_i32_0 : i32, i32, i32
  }
  func.func @transform_1(%arg0: i32) -> (i32, i32, i32) {
    %c0_i32 = arith.constant 0 : i32
    %c0_i32_0 = arith.constant 0 : i32
    %c0_i32_1 = arith.constant 0 : i32
    return %arg0, %c0_i32, %c0_i32_0 : i32, i32, i32
  }
  func.func @transform_2(%arg0: i32) -> (i32, i32, i32) {
    %c0_i32 = arith.constant 0 : i32
    %c0_i32_0 = arith.constant 0 : i32
    %c0_i32_1 = arith.constant 0 : i32
    %c0_i32_2 = arith.constant 0 : i32
    return %c0_i32, %c0_i32_0, %c0_i32_1 : i32, i32, i32
  }
  func.func @transform_3(%arg0: i32) -> (i32, i32, i32) {
    %c0_i32 = arith.constant 0 : i32
    %c0_i32_0 = arith.constant 0 : i32
    %c0_i32_1 = arith.constant 0 : i32
    %c0_i32_2 = arith.constant 0 : i32
    return %c0_i32, %c0_i32_0, %c0_i32_1 : i32, i32, i32
  }
  func.func @transform_4(%arg0: i32) -> (i32, i32, i32) {
    %c0_i32 = arith.constant 0 : i32
    %c0_i32_0 = arith.constant 0 : i32
    %c0_i32_1 = arith.constant 0 : i32
    return %arg0, %c0_i32, %c0_i32_0 : i32, i32, i32
  }
  func.func @transform_5(%arg0: i32) -> (i32, i32, i32) {
    %c0_i32 = arith.constant 0 : i32
    %c0_i32_0 = arith.constant 0 : i32
    %c0_i32_1 = arith.constant 0 : i32
    return %arg0, %c0_i32, %c0_i32_0 : i32, i32, i32
  }
}

module attributes {stable_mosaic.version = 11 : i64} {
  func.func @_bn_relu_kernel(%arg0: i32, %arg1: memref<1x16x128xbf16, #tpu.memory_space<vmem>>, %arg2: memref<1x1x128xf32, #tpu.memory_space<vmem>>, %arg3: memref<1x1x128xf32, #tpu.memory_space<vmem>>, %arg4: memref<1x16x128xf32, #tpu.memory_space<vmem>>) attributes {dimension_semantics = [#tpu.dimension_semantics<parallel>], iteration_bounds = array<i64: 2>, scalar_prefetch = 0 : i64, scratch_operands = 0 : i64, tpu.core_type = #tpu.core_type<tc>, window_params = [{transform_indices = @transform_0, window_bounds = array<i64: 1, 16, 128>}, {pipeline_mode = #tpu.pipeline_mode<synchronous>, transform_indices = @transform_1, window_bounds = array<i64: 1, 1, 128>}, {pipeline_mode = #tpu.pipeline_mode<synchronous>, transform_indices = @transform_2, window_bounds = array<i64: 1, 1, 128>}, {transform_indices = @transform_3, window_bounds = array<i64: 1, 16, 128>}]} {
    %c0 = arith.constant 0 : index
    %c0_0 = arith.constant 0 : index
    %c0_1 = arith.constant 0 : index
    %0 = vector.load %arg1[%c0, %c0_0, %c0_1] : memref<1x16x128xbf16, #tpu.memory_space<vmem>>, vector<1x16x128xbf16>
    %1 = arith.extf %0 : vector<1x16x128xbf16> to vector<1x16x128xf32>
    %c0_2 = arith.constant 0 : index
    %c0_3 = arith.constant 0 : index
    %c0_4 = arith.constant 0 : index
    %2 = vector.load %arg2[%c0_2, %c0_3, %c0_4] : memref<1x1x128xf32, #tpu.memory_space<vmem>>, vector<1x1x128xf32>
    %3 = vector.broadcast %2 : vector<1x1x128xf32> to vector<1x16x128xf32>
    %4 = arith.mulf %1, %3 : vector<1x16x128xf32>
    %c0_5 = arith.constant 0 : index
    %c0_6 = arith.constant 0 : index
    %c0_7 = arith.constant 0 : index
    %5 = vector.load %arg3[%c0_5, %c0_6, %c0_7] : memref<1x1x128xf32, #tpu.memory_space<vmem>>, vector<1x1x128xf32>
    %6 = vector.broadcast %5 : vector<1x1x128xf32> to vector<1x16x128xf32>
    %7 = arith.addf %4, %6 : vector<1x16x128xf32>
    %cst = arith.constant 0.000000e+00 : f32
    %8 = vector.broadcast %cst : f32 to vector<1x16x128xf32>
    %9 = arith.maximumf %7, %8 : vector<1x16x128xf32>
    %c0_8 = arith.constant 0 : index
    %c0_9 = arith.constant 0 : index
    %c0_10 = arith.constant 0 : index
    %10 = vector.load %arg4[%c0_8, %c0_9, %c0_10] : memref<1x16x128xf32, #tpu.memory_space<vmem>>, vector<1x16x128xf32>
    tpu.vector_store %arg4[%c0_8, %c0_9, %c0_10], %9 {strides = array<i32>} : memref<1x16x128xf32, #tpu.memory_space<vmem>>, vector<1x16x128xf32>,
    return
  }
  func.func @transform_0(%arg0: i32) -> (i32, i32, i32) {
    %c0_i32 = arith.constant 0 : i32
    %c0_i32_0 = arith.constant 0 : i32
    %c0_i32_1 = arith.constant 0 : i32
    return %arg0, %c0_i32, %c0_i32_0 : i32, i32, i32
  }
  func.func @transform_1(%arg0: i32) -> (i32, i32, i32) {
    %c0_i32 = arith.constant 0 : i32
    %c0_i32_0 = arith.constant 0 : i32
    %c0_i32_1 = arith.constant 0 : i32
    %c0_i32_2 = arith.constant 0 : i32
    return %c0_i32, %c0_i32_0, %c0_i32_1 : i32, i32, i32
  }
  func.func @transform_2(%arg0: i32) -> (i32, i32, i32) {
    %c0_i32 = arith.constant 0 : i32
    %c0_i32_0 = arith.constant 0 : i32
    %c0_i32_1 = arith.constant 0 : i32
    %c0_i32_2 = arith.constant 0 : i32
    return %c0_i32, %c0_i32_0, %c0_i32_1 : i32, i32, i32
  }
  func.func @transform_3(%arg0: i32) -> (i32, i32, i32) {
    %c0_i32 = arith.constant 0 : i32
    %c0_i32_0 = arith.constant 0 : i32
    %c0_i32_1 = arith.constant 0 : i32
    return %arg0, %c0_i32, %c0_i32_0 : i32, i32, i32
  }
}

module attributes {stable_mosaic.version = 11 : i64} {
  func.func @kernel(%arg0: i32, %arg1: memref<1x16x128xbf16, #tpu.memory_space<vmem>>, %arg2: memref<1x1x128xf32, #tpu.memory_space<vmem>>, %arg3: memref<1x1x128xf32, #tpu.memory_space<vmem>>, %arg4: memref<3x128x128xbf16, #tpu.memory_space<vmem>>, %arg5: memref<1x16x128xbf16, #tpu.memory_space<vmem>>, %arg6: memref<1x2x128xf32, #tpu.memory_space<vmem>>) attributes {dimension_semantics = [#tpu.dimension_semantics<parallel>], iteration_bounds = array<i64: 2>, scalar_prefetch = 0 : i64, scratch_operands = 0 : i64, tpu.core_type = #tpu.core_type<tc>, window_params = [{transform_indices = @transform_0, window_bounds = array<i64: 1, 16, 128>}, {pipeline_mode = #tpu.pipeline_mode<synchronous>, transform_indices = @transform_1, window_bounds = array<i64: 1, 1, 128>}, {pipeline_mode = #tpu.pipeline_mode<synchronous>, transform_indices = @transform_2, window_bounds = array<i64: 1, 1, 128>}, {pipeline_mode = #tpu.pipeline_mode<synchronous>, transform_indices = @transform_3, window_bounds = array<i64: 3, 128, 128>}, {transform_indices = @transform_4, window_bounds = array<i64: 1, 16, 128>}, {transform_indices = @transform_5, window_bounds = array<i64: 1, 2, 128>}]} {
    %c0 = arith.constant 0 : index
    %c0_0 = arith.constant 0 : index
    %c0_1 = arith.constant 0 : index
    %0 = vector.load %arg1[%c0, %c0_0, %c0_1] : memref<1x16x128xbf16, #tpu.memory_space<vmem>>, vector<1x16x128xbf16>
    %1 = vector.shape_cast %0 : vector<1x16x128xbf16> to vector<16x128xbf16>
    %2 = arith.extf %1 : vector<16x128xbf16> to vector<16x128xf32>
    %c0_2 = arith.constant 0 : index
    %c0_3 = arith.constant 0 : index
    %c0_4 = arith.constant 0 : index
    %3 = vector.load %arg2[%c0_2, %c0_3, %c0_4] : memref<1x1x128xf32, #tpu.memory_space<vmem>>, vector<1x1x128xf32>
    %4 = vector.shape_cast %3 : vector<1x1x128xf32> to vector<1x128xf32>
    %5 = vector.broadcast %4 : vector<1x128xf32> to vector<16x128xf32>
    %6 = arith.mulf %2, %5 : vector<16x128xf32>
    %c0_5 = arith.constant 0 : index
    %c0_6 = arith.constant 0 : index
    %c0_7 = arith.constant 0 : index
    %7 = vector.load %arg3[%c0_5, %c0_6, %c0_7] : memref<1x1x128xf32, #tpu.memory_space<vmem>>, vector<1x1x128xf32>
    %8 = vector.shape_cast %7 : vector<1x1x128xf32> to vector<1x128xf32>
    %9 = vector.broadcast %8 : vector<1x128xf32> to vector<16x128xf32>
    %10 = arith.addf %6, %9 : vector<16x128xf32>
    %cst = arith.constant 0.000000e+00 : f32
    %11 = vector.broadcast %cst : f32 to vector<16x128xf32>
    %12 = arith.maximumf %10, %11 : vector<16x128xf32>
    %cst_8 = arith.constant 0.000000e+00 : f32
    %13 = vector.broadcast %cst_8 : f32 to vector<1x128xf32>
    %14 = tpu.concatenate %13, %12, %13 in 0 : vector<1x128xf32>, vector<16x128xf32>, vector<1x128xf32> -> vector<18x128xf32>
    %15 = arith.truncf %14 : vector<18x128xf32> to vector<18x128xbf16>
    %16 = vector.extract_strided_slice %15 {offsets = [0, 0], sizes = [16, 128], strides = [1, 1]} : vector<18x128xbf16> to vector<16x128xbf16>
    %c0_9 = arith.constant 0 : index
    %c0_10 = arith.constant 0 : index
    %c0_11 = arith.constant 0 : index
    %17 = vector.load %arg4[%c0_9, %c0_10, %c0_11] : memref<3x128x128xbf16, #tpu.memory_space<vmem>>, vector<1x128x128xbf16>
    %18 = vector.shape_cast %17 : vector<1x128x128xbf16> to vector<128x128xbf16>
    %cst_12 = arith.constant dense<0.000000e+00> : vector<16x128xf32>
    %19 = tpu.matmul %16, %18, %cst_12 {dimension_numbers = #tpu.dot_dimension_numbers<[1], [0], [0], [1], [0, 0, 1, 1], [], []>} : vector<16x128xbf16>, vector<128x128xbf16>, vector<16x128xf32> -> vector<16x128xf32>
    %20 = vector.extract_strided_slice %15 {offsets = [1, 0], sizes = [16, 128], strides = [1, 1]} : vector<18x128xbf16> to vector<16x128xbf16>
    %c1 = arith.constant 1 : index
    %c0_13 = arith.constant 0 : index
    %c0_14 = arith.constant 0 : index
    %21 = vector.load %arg4[%c1, %c0_13, %c0_14] : memref<3x128x128xbf16, #tpu.memory_space<vmem>>, vector<1x128x128xbf16>
    %22 = vector.shape_cast %21 : vector<1x128x128xbf16> to vector<128x128xbf16>
    %cst_15 = arith.constant dense<0.000000e+00> : vector<16x128xf32>
    %23 = tpu.matmul %20, %22, %cst_15 {dimension_numbers = #tpu.dot_dimension_numbers<[1], [0], [0], [1], [0, 0, 1, 1], [], []>} : vector<16x128xbf16>, vector<128x128xbf16>, vector<16x128xf32> -> vector<16x128xf32>
    %24 = arith.addf %19, %23 : vector<16x128xf32>
    %25 = vector.extract_strided_slice %15 {offsets = [2, 0], sizes = [16, 128], strides = [1, 1]} : vector<18x128xbf16> to vector<16x128xbf16>
    %c2 = arith.constant 2 : index
    %c0_16 = arith.constant 0 : index
    %c0_17 = arith.constant 0 : index
    %26 = vector.load %arg4[%c2, %c0_16, %c0_17] : memref<3x128x128xbf16, #tpu.memory_space<vmem>>, vector<1x128x128xbf16>
    %27 = vector.shape_cast %26 : vector<1x128x128xbf16> to vector<128x128xbf16>
    %cst_18 = arith.constant dense<0.000000e+00> : vector<16x128xf32>
    %28 = tpu.matmul %25, %27, %cst_18 {dimension_numbers = #tpu.dot_dimension_numbers<[1], [0], [0], [1], [0, 0, 1, 1], [], []>} : vector<16x128xbf16>, vector<128x128xbf16>, vector<16x128xf32> -> vector<16x128xf32>
    %29 = arith.addf %24, %28 : vector<16x128xf32>
    %30 = arith.truncf %29 : vector<16x128xf32> to vector<16x128xbf16>
    %31 = vector.shape_cast %30 : vector<16x128xbf16> to vector<1x16x128xbf16>
    %c0_19 = arith.constant 0 : index
    %c0_20 = arith.constant 0 : index
    %c0_21 = arith.constant 0 : index
    %32 = vector.load %arg5[%c0_19, %c0_20, %c0_21] : memref<1x16x128xbf16, #tpu.memory_space<vmem>>, vector<1x16x128xbf16>
    tpu.vector_store %arg5[%c0_19, %c0_20, %c0_21], %31 {strides = array<i32>} : memref<1x16x128xbf16, #tpu.memory_space<vmem>>, vector<1x16x128xbf16>,
    %cst_22 = arith.constant dense<0.000000e+00> : vector<128xf32>
    %33 = vector.multi_reduction <add>, %29, %cst_22 [0] : vector<16x128xf32> to vector<128xf32>
    %34 = vector.shape_cast %33 : vector<128xf32> to vector<1x128xf32>
    %35 = arith.mulf %29, %29 : vector<16x128xf32>
    %cst_23 = arith.constant dense<0.000000e+00> : vector<128xf32>
    %36 = vector.multi_reduction <add>, %35, %cst_23 [0] : vector<16x128xf32> to vector<128xf32>
    %37 = vector.shape_cast %36 : vector<128xf32> to vector<1x128xf32>
    %38 = tpu.concatenate %34, %37 in 0 : vector<1x128xf32>, vector<1x128xf32> -> vector<2x128xf32>
    %39 = vector.shape_cast %38 : vector<2x128xf32> to vector<1x2x128xf32>
    %c0_24 = arith.constant 0 : index
    %c0_25 = arith.constant 0 : index
    %c0_26 = arith.constant 0 : index
    %40 = vector.load %arg6[%c0_24, %c0_25, %c0_26] : memref<1x2x128xf32, #tpu.memory_space<vmem>>, vector<1x2x128xf32>
    tpu.vector_store %arg6[%c0_24, %c0_25, %c0_26], %39 {strides = array<i32>} : memref<1x2x128xf32, #tpu.memory_space<vmem>>, vector<1x2x128xf32>,
    return
  }
  func.func @transform_0(%arg0: i32) -> (i32, i32, i32) {
    %c0_i32 = arith.constant 0 : i32
    %c0_i32_0 = arith.constant 0 : i32
    %c0_i32_1 = arith.constant 0 : i32
    return %arg0, %c0_i32, %c0_i32_0 : i32, i32, i32
  }
  func.func @transform_1(%arg0: i32) -> (i32, i32, i32) {
    %c0_i32 = arith.constant 0 : i32
    %c0_i32_0 = arith.constant 0 : i32
    %c0_i32_1 = arith.constant 0 : i32
    %c0_i32_2 = arith.constant 0 : i32
    return %c0_i32, %c0_i32_0, %c0_i32_1 : i32, i32, i32
  }
  func.func @transform_2(%arg0: i32) -> (i32, i32, i32) {
    %c0_i32 = arith.constant 0 : i32
    %c0_i32_0 = arith.constant 0 : i32
    %c0_i32_1 = arith.constant 0 : i32
    %c0_i32_2 = arith.constant 0 : i32
    return %c0_i32, %c0_i32_0, %c0_i32_1 : i32, i32, i32
  }
  func.func @transform_3(%arg0: i32) -> (i32, i32, i32) {
    %c0_i32 = arith.constant 0 : i32
    %c0_i32_0 = arith.constant 0 : i32
    %c0_i32_1 = arith.constant 0 : i32
    %c0_i32_2 = arith.constant 0 : i32
    return %c0_i32, %c0_i32_0, %c0_i32_1 : i32, i32, i32
  }
  func.func @transform_4(%arg0: i32) -> (i32, i32, i32) {
    %c0_i32 = arith.constant 0 : i32
    %c0_i32_0 = arith.constant 0 : i32
    %c0_i32_1 = arith.constant 0 : i32
    return %arg0, %c0_i32, %c0_i32_0 : i32, i32, i32
  }
  func.func @transform_5(%arg0: i32) -> (i32, i32, i32) {
    %c0_i32 = arith.constant 0 : i32
    %c0_i32_0 = arith.constant 0 : i32
    %c0_i32_1 = arith.constant 0 : i32
    return %arg0, %c0_i32, %c0_i32_0 : i32, i32, i32
  }
}

</mosaic_0001>

<bundles_post_ra>
// kernel: tile.28
= control target key start
LH: loop header
LB: loop body
LE: loop exit
PB: predicated region body
PF: predicated region fallthrough
CT: control target
= control target key end

     0   :  { %s28_s0 = inlined_call_operand.vmem [shape: f32[8], index: 0, kind: input, shape index: {}]   ;;  %s29_s1 = inlined_call_operand.vmem [shape: f32[16,8], index: 1, kind: output, shape index: {}]  }
   0x1   :  { %v4_v0 = vld [vmem:[%s28_s0] ss:$0 sm:$0xff] }
   0x2   :  { %5 = vst [vmem:[%s29_s1] sm:$0xff] %v4_v0 }
   0x3   :  { %8 = vst [vmem:[%s29_s1 + $0x8] sm:$0xff] %v4_v0 }

// kernel: tile.29
= control target key start
LH: loop header
LB: loop body
LE: loop exit
PB: predicated region body
PF: predicated region fallthrough
CT: control target
= control target key end

     0   :  { %s131_s10 = smov 120   ;;  %s132_s11 = smov 104   ;;  %vm3_vm0 = vcmask 64512   ;;  %vm9_vm1 = vcmask 1048512   ;;  %vm15_vm2 = vcmask 982912   ;;  %vm21_vm3 = vcmask 917312   ;;  %s207_s0 = inlined_call_operand.vmem [shape: f32[16,8], index: 0, kind: input, shape index: {}]   ;;  %s208_s1 = inlined_call_operand.vmem [shape: f32[1,1,128], index: 1, kind: output, shape index: {}]  }
   0x1   :  { %v101_v0 = vld [vmem:[%s207_s0 + $0xf] sm:$0x1]   ;;  %v103_v1 = vld [vmem:[%s207_s0 + $0xd] sm:$0x1]   ;;  %v105_v2 = vld [vmem:[%s207_s0 + $0xb] sm:$0x1]  }
   0x2   :  { %7 = vrot.lane.b32.xlu0 %v101_v0, %s131_s10  ;;  %19 = vrot.lane.b32.xlu1 %v103_v1, %s132_s11  ;;  %s133_s14 = smov 88   ;;  %v102_v3 = vld [vmem:[%s207_s0 + $0xe] sm:$0x1]   ;;  %v104_v4 = vld [vmem:[%s207_s0 + $0xc] sm:$0x1]   ;;  %s134_s19 = smov 112  }
   0x3   :  { %31 = vrot.lane.b32.xlu2 %v105_v2, %s133_s14  ;;  %s135_s20 = smov 96   ;;  %v106_v5 = vld [vmem:[%s207_s0 + $0xa] sm:$0x1]   ;;  %s136_s23 = smov 80   ;;  %v107_v6 = vld [vmem:[%s207_s0 + $0x9] sm:$0x1]  }
   0x4   :  { %v108_v7 = vld [vmem:[%s207_s0 + $0x8] sm:$0x1]   ;;  %s137_s28 = smov 72   ;;  %s138_s29 = smov 64   ;;  %v109_v8 = vld [vmem:[%s207_s0 + $0x7] sm:$0x1]  }
   0x5   :  { %s139_s3 = smov 56   ;;  %v110_v9 = vld [vmem:[%s207_s0 + $0x6] sm:$0x1]   ;;  %v111_v10 = vld [vmem:[%s207_s0 + $0x5] sm:$0x1]   ;;  %s140_s8 = smov 48  }
   0x6   :  { %s141_s9 = smov 40   ;;  %v112_v11 = vld [vmem:[%s207_s0 + $0x4] sm:$0x1]   ;;  %s142_s12 = smov 32   ;;  %v113_v12 = vld [vmem:[%s207_s0 + $0x3] sm:$0x1]  }
   0x7   :  { %v114_v13 = vld [vmem:[%s207_s0 + $0x2] sm:$0x1]   ;;  %s143_s17 = smov 24   ;;  %s144_s18 = smov 16   ;;  %v115_v14 = vld [vmem:[%s207_s0 + $0x1] sm:$0x1]  }
   0x8   :  { %s145_s21 = smov 8   ;;  %v2_v15 = vld [vmem:[%s207_s0] sm:$0x1]   ;;  %vm27_vm4 = vcmask 851712   ;;  %vm33_vm5 = vcmask 786112   ;;  %vm39_vm6 = vcmask 720512  }
   0x9   :  { %4 = vst.msk [vmem:[#allocation0] sm:$0x1] %vm3_vm0, %v2_v15   ;;  %vm45_vm7 = vcmask 654912   ;;  %vm51_vm8 = vcmask 589312   ;;  %vm57_vm9 = vcmask 523712   ;;  %vm63_vm10 = vcmask 458112  }
   0xa   :  { %13 = vrot.lane.b32.xlu0 %v102_v3, %s134_s19  ;;  %25 = vrot.lane.b32.xlu1 %v104_v4, %s135_s20  ;;  %vm69_vm11 = vcmask 392512   ;;  %vm75_vm12 = vcmask 326912   ;;  %vm81_vm13 = vcmask 261312   ;;  %vm87_vm14 = vcmask 195712  }
   0xb   :  { %37 = vrot.lane.b32.xlu2 %v106_v5, %s136_s23  ;;  %vm93_vm15 = vcmask 130112  }
  0x12   :  { %43 = vrot.lane.b32.xlu0 %v107_v6, %s137_s28  ;;  %49 = vrot.lane.b32.xlu1 %v108_v7, %s138_s29 }
  0x13   :  { %55 = vrot.lane.b32.xlu2 %v109_v8, %s139_s3 }
  0x1a   :  { %61 = vrot.lane.b32.xlu0 %v110_v9, %s140_s8  ;;  %67 = vrot.lane.b32.xlu1 %v111_v10, %s141_s9 }
  0x1b   :  { %73 = vrot.lane.b32.xlu2 %v112_v11, %s142_s12 }
  0x22   :  { %79 = vrot.lane.b32.xlu0 %v113_v12, %s143_s17  ;;  %85 = vrot.lane.b32.xlu1 %v114_v13, %s144_s18 }
  0x23   :  { %91 = vrot.lane.b32.xlu2 %v115_v14, %s145_s21 }
  0x5d   :  { %v32_v16 = vpop.permute.xlu2 %31  }
  0x65   :  { %v38_v17 = vpop.permute.xlu2 %37  }
  0x6d   :  { %v56_v18 = vpop.permute.xlu2 %55  }
  0x74   :  { %v8_v19 = vpop.permute.xlu0 %7   ;;  %v20_v20 = vpop.permute.xlu1 %19  }
  0x75   :  { %10 = vst.msk [vmem:[#allocation0] sm:$0x1] %vm9_vm1, %v8_v19   ;;  %v74_v21 = vpop.permute.xlu2 %73  }
  0x7c   :  { %v14_v22 = vpop.permute.xlu0 %13   ;;  %v26_v23 = vpop.permute.xlu1 %25  }
  0x7d   :  { %16 = vst.msk [vmem:[#allocation0] sm:$0x1] %vm15_vm2, %v14_v22   ;;  %v92_v24 = vpop.permute.xlu2 %91  }
  0x7e   :  { %22 = vst.msk [vmem:[#allocation0] sm:$0x1] %vm21_vm3, %v20_v20  }
  0x7f   :  { %28 = vst.msk [vmem:[#allocation0] sm:$0x1] %vm27_vm4, %v26_v23  }
  0x80   :  { %34 = vst.msk [vmem:[#allocation0] sm:$0x1] %vm33_vm5, %v32_v16  }
  0x81   :  { %40 = vst.msk [vmem:[#allocation0] sm:$0x1] %vm39_vm6, %v38_v17  }
  0x84   :  { %v44_v25 = vpop.permute.xlu0 %43   ;;  %v50_v26 = vpop.permute.xlu1 %49  }
  0x85   :  { %46 = vst.msk [vmem:[#allocation0] sm:$0x1] %vm45_vm7, %v44_v25  }
  0x86   :  { %52 = vst.msk [vmem:[#allocation0] sm:$0x1] %vm51_vm8, %v50_v26  }
  0x87   :  { %58 = vst.msk [vmem:[#allocation0] sm:$0x1] %vm57_vm9, %v56_v18  }
  0x8c   :  { %v62_v27 = vpop.permute.xlu0 %61   ;;  %v68_v28 = vpop.permute.xlu1 %67  }
  0x8d   :  { %64 = vst.msk [vmem:[#allocation0] sm:$0x1] %vm63_vm10, %v62_v27  }
  0x8e   :  { %70 = vst.msk [vmem:[#allocation0] sm:$0x1] %vm69_vm11, %v68_v28  }
  0x8f   :  { %76 = vst.msk [vmem:[#allocation0] sm:$0x1] %vm75_vm12, %v74_v21  }
  0x94   :  { %v80_v29 = vpop.permute.xlu0 %79   ;;  %v86_v30 = vpop.permute.xlu1 %85  }
  0x95   :  { %82 = vst.msk [vmem:[#allocation0] sm:$0x1] %vm81_vm13, %v80_v29  }
  0x96   :  { %88 = vst.msk [vmem:[#allocation0] sm:$0x1] %vm87_vm14, %v86_v30  }
  0x97   :  { %94 = vst.msk [vmem:[#allocation0] sm:$0x1] %vm93_vm15, %v92_v24  }
  0x9e   :  { %v97_v31 = vld [vmem:[#allocation0] sm:$0x1] }
  0x9f   :  { %100 = vst [vmem:[%s208_s1] sm:$0x1] %v97_v31 }

// kernel: up_forward.3
= control target key start
LH: loop header
LB: loop body
LE: loop exit
PB: predicated region body
PF: predicated region fallthrough
CT: control target
= control target key end

     0   :  { %s970_s18 = smov 0   ;;  %s1080_s0 = inlined_call_operand.vmem [shape: bf16[2,18,64], index: 0, kind: input, shape index: {}]   ;;  %s1081_s1 = inlined_call_operand.vmem [shape: bf16[2,18,64], index: 1, kind: input, shape index: {}]   ;;  %s1082_s2 = inlined_call_operand.vmem [shape: bf16[3,64,128], index: 2, kind: input, shape index: {}]   ;;  %s1083_s3 = inlined_call_operand.vmem [shape: bf16[3,64,128], index: 3, kind: input, shape index: {}]   ;;  %s1084_s4 = inlined_call_operand.vmem [shape: bf16[2,16,128], index: 4, kind: output, shape index: {0}]   ;;  %s1085_s5 = inlined_call_operand.vmem [shape: f32[2,2,128], index: 5, kind: output, shape index: {1}]  }
   0x1 LB: > { %s737_s19 = sadd.s32 4294967295, %s938_s18   ;;  %p741_p0 = scmp.ge.s32.totalorder %s938_s18, 1  ;;  %s938_s18 = sphi %s970_s18, %s16_s18  }
   0x2   : > { %p200_p1 = scmp.lt.s32.totalorder %s938_s18, 3 }
   0x4   : > { %p201_p2 = pnand %p741_p0, %p200_p1 }
   0x5   : > { %p237_p3 = scmp.lt.s32.totalorder (!%p201_p2), %s737_s19, 1 }
   0x6   : > { %204 = sbr.rel (%p201_p2) target bundleno = 199 (0xc7), region = 36 }
   0xb   : > { %v900_v0 = vld [vmem:[%s1082_s2 + $0x38] sm:$0xff]  ;;  %v899_v4 = vld [vmem:[%s1082_s2 + $0x30] sm:$0xff]  ;;  %s1087_s19 = smov (!%p237_p3, %s737_s19), 1  ;;  %v898_v8 = vld [vmem:[%s1082_s2 + $0x28] sm:$0xff]  ;;  %vm389_vm0 = vcmask 1046528   ;;  %vm322_vm2 = vcmask 523264  }
   0xc   : > { %v896_v1 = vld [vmem:[%s1082_s2 + $0x18] sm:$0xff]  ;;  %330 = vmatpush.bf16.msra.mxu0 %v900_v0  ;;  %v895_v5 = vld [vmem:[%s1082_s2 + $0x10] sm:$0xff]  ;;  %s923_s11 = smul.u32 12, %s1087_s19  ;;  %v894_v9 = vld [vmem:[%s1082_s2 + $0x8] sm:$0xff]  ;;  %vm285_vm1 = vsmask.f32 7424 }
   0xd   : > { %v904_v2 = vld [vmem:[%s1082_s2 + $0x58] sm:$0xff]  ;;  %370 = vmatpush.bf16.msra.mxu1 %v896_v1  ;;  %v903_v6 = vld [vmem:[%s1082_s2 + $0x50] sm:$0xff]  ;;  %v902_v10 = vld [vmem:[%s1082_s2 + $0x48] sm:$0xff]  ;;  %s891_s29 = sshll.u32 %s1087_s19, 3  ;;  %s746_s8 = sshll.u32 %s1087_s19, 1  ;;  %vm636_vm3 = vcmask 1040384  }
   0xe   : > { %v909_v3 = vld [vmem:[%s1083_s3 + $0x18] sm:$0xff]  ;;  %424 = vmatpush.bf16.msra.mxu2 %v904_v2  ;;  %v908_v7 = vld [vmem:[%s1083_s3 + $0x10] sm:$0xff]  ;;  %s241_s22 = scalar_lea.vmem %s1080_s0, %s923_s11  ;;  %v907_v11 = vld [vmem:[%s1083_s3 + $0x8] sm:$0xff]  ;;  %s246_s6 = scalar_lea.vmem %s1081_s1, %s923_s11 }
   0xf   : > { %483 = vmatpush.bf16.msra.mxu3 %v909_v3  ;;  %v892_v12 = vld [vmem:[%s241_s22] sm:$0xff]  ;;  %v259_v13 = vld [vmem:[%s241_s22 + $0x8] sm:$0x1]  ;;  %v913_v27 = vld [vmem:[%s1083_s3 + $0x38] sm:$0xff]  ;;  %s251_s7 = scalar_lea.vmem %s1084_s4, %s891_s29  ;;  %s255_s12 = scalar_lea.vmem %s1085_s5, %s746_s8 }
  0x10   : > { %331 = vmatpush.bf16.msra.mxu0 %v899_v4  ;;  %v282_v14 = vunpack.c.l.b16 %v259_v13  ;;  %v287_v15 = vshrl.u32 %v892_v12, 16  ;;  %v289_v16 = vshll.u32 %v892_v12, 16  ;;  %v897_v17 = vld [vmem:[%s1082_s2 + $0x20] sm:$0xff]  ;;  %v390_v23 = vrot.slane %v892_v12, 1  ;;  %v438_v24 = vld [vmem:[%s246_s6 + $0x8] sm:$0x1] }
  0x11   : > { %371 = vmatpush.bf16.msra.mxu1 %v895_v5  ;;  %v893_v18 = vld [vmem:[%s1082_s2] sm:$0xff]  ;;  %v917_v28 = vld [vmem:[%s1083_s3 + $0x58] sm:$0xff]  ;;  %v505_v32 = vunpack.c.l.b16 %v438_v24  ;;  %v912_v35 = vld [vmem:[%s1083_s3 + $0x30] sm:$0xff] }
  0x12   : > { %425 = vmatpush.bf16.msra.mxu2 %v903_v6  ;;  %v284_v19 = vpack.c.b16 %v282_v14, %v282_v14  ;;  %v901_v20 = vld [vmem:[%s1082_s2 + $0x40] sm:$0xff]  ;;  %v291_v22 = vrot.slane %v289_v16, 1  ;;  %v916_v36 = vld [vmem:[%s1083_s3 + $0x50] sm:$0xff]  ;;  %v911_v39 = vld [vmem:[%s1083_s3 + $0x28] sm:$0xff] }
  0x13   : > { %484 = vmatpush.bf16.msra.mxu3 %v908_v7  ;;  %v906_v21 = vld [vmem:[%s1083_s3] sm:$0xff]  ;;  %v506_v37 = vpack.c.b16 %v505_v32, %v505_v32  ;;  %v915_v40 = vld [vmem:[%s1083_s3 + $0x48] sm:$0xff] }
  0x14   : > { %332 = vmatpush.bf16.msra.mxu0 %v898_v8  ;;  %v294_v25 = vshll.u32 %v284_v19, 16  ;;  %v391_v26 = vrot.slane %v284_v19, 1  ;;  %v292_v29 = vor.u32 %v291_v22, %v287_v15  ;;  %v905_v31 = vld [vmem:[%s246_s6] sm:$0xff] }
  0x15   : > { %372 = vmatpush.bf16.msra.mxu1 %v894_v9  ;;  %v509_v38 = vshll.u32 %v905_v31, 16  ;;  %v507_v41 = vshrl.u32 %v905_v31, 16  ;;  %v514_v43 = vshll.u32 %v506_v37, 16  ;;  %v910_v44 = vld [vmem:[%s1083_s3 + $0x20] sm:$0xff]  ;;  %v570_v48 = vrot.slane %v905_v31, 1 }
  0x16   : > { %426 = vmatpush.bf16.msra.mxu2 %v902_v10  ;;  %v296_v30 = vrot.slane %v294_v25, 1  ;;  %v392_v33 = vsel %vm389_vm0, %v390_v23, %v391_v26  ;;  %v914_v45 = vld [vmem:[%s1083_s3 + $0x40] sm:$0xff]  ;;  %v571_v49 = vrot.slane %v506_v37, 1 }
  0x17   : > { %485 = vmatpush.bf16.msra.mxu3 %v907_v11  ;;  %v511_v42 = vrot.slane %v509_v38, 1  ;;  %v516_v47 = vrot.slane %v514_v43, 1 }
  0x18   : > { %333 = vmatpush.bf16.msra.mxu0 %v897_v17  ;;  %v297_v34 = vsel %vm285_vm1, %v292_v29, %v296_v30  ;;  %v572_v51 = vsel %vm389_vm0, %v570_v48, %v571_v49 }
  0x19   : > { %373 = vmatpush.bf16.msra.mxu1 %v893_v18  ;;  %v512_v46 = vor.u32 %v511_v42, %v507_v41 }
  0x1a   : > { %427 = vmatpush.bf16.msra.mxu2 %v901_v20 }
  0x1b   : > { %486 = vmatpush.bf16.msra.mxu3 %v906_v21  ;;  %775 = vmatmul.msk.bf16.vlgmr.msra.gmra.mxu0 %vm322_vm2, %v297_v34  ;;  %v517_v50 = vsel %vm285_vm1, %v512_v46, %v516_v47 }
  0x1c   : > { %549 = vmatpush.bf16.msrb.mxu0 %v913_v27  ;;  %792 = vmatmul.msk.bf16.vlgmr.msra.gmra.mxu1 %vm322_vm2, %v892_v12 }
  0x1d   : > { %604 = vmatpush.bf16.msrb.mxu1 %v917_v28  ;;  %817 = vmatmul.msk.bf16.vlgmr.msra.gmra.mxu2 %vm322_vm2, %v392_v33 }
  0x1e   : > { %838 = vmatmul.msk.bf16.vlgmr.msra.gmra.mxu3 %vm322_vm2, %v905_v31 }
  0x20   : > { %550 = vmatpush.bf16.msrb.mxu0 %v912_v35 }
  0x21   : > { %605 = vmatpush.bf16.msrb.mxu1 %v916_v36 }
  0x24   : > { %551 = vmatpush.bf16.msrb.mxu0 %v911_v39 }
  0x25   : > { %606 = vmatpush.bf16.msrb.mxu1 %v915_v40 }
  0x28   : > { %552 = vmatpush.bf16.msrb.mxu0 %v910_v44 }
  0x29   : > { %607 = vmatpush.bf16.msrb.mxu1 %v914_v45 }
  0x2b   : > { %863 = vmatmul.msk.bf16.vlgmr.msrb.gmra.mxu0 %vm322_vm2, %v517_v50 }
  0x2c   : > { %888 = vmatmul.msk.bf16.vlgmr.msrb.gmra.mxu1 %vm322_vm2, %v572_v51 }
  0x98   : > { %v335_v52 = vpop.f32.mrf.mxu0 }
  0x99   : > { %v375_v53 = vpop.f32.mrf.mxu1 }
  0x9a   : > { %v376_v58 = vadd.f32 %v375_v53, %v335_v52 }
  0xa0   : > { %v429_v54 = vpop.f32.mrf.mxu2  ;;  %v337_v55 = vpop.f32.mrf.mxu0 }
  0xa1   : > { %v377_v56 = vpop.f32.mrf.mxu1  ;;  %v488_v57 = vpop.f32.mrf.mxu3  ;;  %v434_v59 = vadd.f32 %v429_v54, %v376_v58 }
  0xa2   : > { %v378_v63 = vadd.f32 %v377_v56, %v337_v55 }
  0xa3   : > { %v493_v0 = vadd.f32 %v488_v57, %v434_v59 }
  0xa8   : > { %v431_v60 = vpop.f32.mrf.mxu2  ;;  %v554_v61 = vpop.f32.mrf.mxu0 }
  0xa9   : > { %v609_v62 = vpop.f32.mrf.mxu1  ;;  %v435_v1 = vadd.f32 %v431_v60, %v378_v63  ;;  %v559_v2 = vadd.f32 %v554_v61, %v493_v0  ;;  %v490_v3 = vpop.f32.mrf.mxu3 }
  0xab   : > { %v494_v4 = vadd.f32 %v490_v3, %v435_v1  ;;  %v614_v6 = vadd.f32 %v609_v62, %v559_v2 }
  0xad   : > { %v627_v10 = vmul.f32 %v614_v6, %v614_v6 }
  0xb0   : > { %v556_v5 = vpop.f32.mrf.mxu0 }
  0xb1   : > { %v560_v7 = vadd.f32 %v556_v5, %v494_v4  ;;  %v611_v8 = vpop.f32.mrf.mxu1 }
  0xb3   : > { %v615_v9 = vadd.f32 %v611_v8, %v560_v7 }
  0xb5   : > { %v921_v11 = vpack.c.bf16 %v615_v9, %v614_v6  ;;  %v620_v12 = vadd.f32 %v615_v9, %v614_v6  ;;  %v628_v13 = vmul.f32 %v615_v9, %v615_v9 }
  0xb7   : > { %922 = vst [vmem:[%s251_s7] sm:$0xff] %v921_v11   ;;  %v621_v14 = vrot.slane %v620_v12, 4  ;;  %v629_v15 = vadd.f32 %v628_v13, %v627_v10 }
  0xb9   : > { %v622_v16 = vadd.f32 %v621_v14, %v620_v12  ;;  %v630_v17 = vrot.slane %v629_v15, 4 }
  0xbb   : > { %v623_v18 = vrot.slane %v622_v16, 2  ;;  %v631_v19 = vadd.f32 %v630_v17, %v629_v15 }
  0xbd   : > { %v624_v20 = vadd.f32 %v623_v18, %v622_v16  ;;  %v632_v21 = vrot.slane %v631_v19, 2 }
  0xbf   : > { %v625_v22 = vrot.slane %v624_v20, 1  ;;  %v633_v23 = vadd.f32 %v632_v21, %v631_v19 }
  0xc1   : > { %v634_v24 = vrot.slane %v633_v23, 1  ;;  %v626_v25 = vadd.f32 %v625_v22, %v624_v20 }
  0xc3   : > { %v635_v26 = vadd.f32 %v634_v24, %v633_v23 }
  0xc5   : > { %v637_v27 = vsel %vm636_vm3, %v626_v25, %v635_v26 }
  0xc6   : > { %638 = vst [vmem:[%s255_s12] sm:$0x3] %v637_v27 }
  0xc7 PF: > { %s16_s18 = sadd.s32 1, %s938_s18  }
  0xc8   : > { %p13_p4 = scmp.ge.s32.totalorder %s16_s18, 4  }
  0xca   :  { %15 = sbr.rel (!%p13_p4) target bundleno = 1 (0x1), region = 85 }

// kernel: up_forward.5
= control target key start
LH: loop header
LB: loop body
LE: loop exit
PB: predicated region body
PF: predicated region fallthrough
CT: control target
= control target key end

     0   :  { %s301_s12 = smov 0   ;;  %s318_s0 = inlined_call_operand.vmem [shape: bf16[2,16,128], index: 0, kind: input, shape index: {}]   ;;  %s319_s1 = inlined_call_operand.vmem [shape: f32[1,1,128], index: 1, kind: input, shape index: {}]   ;;  %s320_s2 = inlined_call_operand.vmem [shape: f32[1,1,128], index: 2, kind: input, shape index: {}]   ;;  %s321_s3 = inlined_call_operand.vmem [shape: f32[2,16,128], index: 3, kind: output, shape index: {}]  }
   0x1 LB: > { %s246_s13 = sadd.s32 4294967295, %s279_s12   ;;  %p250_p0 = scmp.ge.s32.totalorder %s279_s12, 1  ;;  %s279_s12 = sphi %s301_s12, %s13_s12  }
   0x2   : > { %p137_p1 = scmp.lt.s32.totalorder %s279_s12, 3 }
   0x4   : > { %p138_p2 = pnand %p250_p0, %p137_p1 }
   0x5   : > { %p161_p3 = scmp.lt.s32.totalorder (!%p138_p2), %s246_s13, 1 }
   0x6   : > { %141 = sbr.rel (%p138_p2) target bundleno = 25 (0x19), region = 32 }
   0xb   : > { %s323_s13 = smov (!%p161_p3, %s246_s13), 1  ;;  %v271_v0 = vld [vmem:[%s319_s1] ss:$0 sm:$0xff] }
   0xc   : > { %s257_s14 = sshll.u32 %s323_s13, 3  ;;  %v272_v3 = vld [vmem:[%s320_s2] ss:$0 sm:$0xff]  ;;  %s258_s22 = sshll.u32 %s323_s13, 4 }
   0xd   : > { %s165_s17 = scalar_lea.vmem %s318_s0, %s257_s14  ;;  %s170_s25 = scalar_lea.vmem %s321_s3, %s258_s22 }
   0xe   : > { %v260_v1 = vld [vmem:[%s165_s17] sm:$0xff]  }
   0xf   : > { %v261_v2 = vunpack.c.l.bf16 %v260_v1  ;;  %v262_v4 = vunpack.c.h.bf16 %v260_v1 }
  0x11   : > { %v179_v5 = vmul.f32 %v271_v0, %v261_v2  ;;  %v180_v6 = vmul.f32 %v271_v0, %v262_v4 }
  0x13   : > { %v185_v7 = vadd.f32 %v272_v3, %v179_v5  ;;  %v186_v8 = vadd.f32 %v272_v3, %v180_v6 }
  0x15   : > { %v187_v9 = vmax.f32 %v185_v7, 0.0  ;;  %v188_v10 = vmax.f32 %v186_v8, 0.0 }
  0x17   : > { %189 = vst [vmem:[%s170_s25] sm:$0xff] %v187_v9 }
  0x18   : > { %190 = vst [vmem:[%s170_s25 + $0x8] sm:$0xff] %v188_v10 }
  0x19 PF: > { %s13_s12 = sadd.s32 1, %s279_s12  }
  0x1a   : > { %p10_p4 = scmp.ge.s32.totalorder %s13_s12, 4  }
  0x1c   :  { %12 = sbr.rel (!%p10_p4) target bundleno = 1 (0x1), region = 62 }

// kernel: up_forward.4
= control target key start
LH: loop header
LB: loop body
LE: loop exit
PB: predicated region body
PF: predicated region fallthrough
CT: control target
= control target key end

     0   :  { %s865_s18 = smov 0   ;;  %s975_s0 = inlined_call_operand.vmem [shape: bf16[2,16,128], index: 0, kind: input, shape index: {}]   ;;  %s976_s1 = inlined_call_operand.vmem [shape: f32[1,1,128], index: 1, kind: input, shape index: {}]   ;;  %s977_s2 = inlined_call_operand.vmem [shape: f32[1,1,128], index: 2, kind: input, shape index: {}]   ;;  %s978_s3 = inlined_call_operand.vmem [shape: bf16[3,128,128], index: 3, kind: input, shape index: {}]   ;;  %s979_s4 = inlined_call_operand.vmem [shape: bf16[2,16,128], index: 4, kind: output, shape index: {0}]   ;;  %s980_s5 = inlined_call_operand.vmem [shape: f32[2,2,128], index: 5, kind: output, shape index: {1}]  }
   0x1 LB: > { %s642_s19 = sadd.s32 4294967295, %s833_s18   ;;  %p646_p0 = scmp.ge.s32.totalorder %s833_s18, 1  ;;  %s833_s18 = sphi %s865_s18, %s16_s18  }
   0x2   : > { %p190_p1 = scmp.lt.s32.totalorder %s833_s18, 3 }
   0x4   : > { %p191_p2 = pnand %p646_p0, %p190_p1 }
   0x5   : > { %p222_p3 = scmp.lt.s32.totalorder (!%p191_p2), %s642_s19, 1 }
   0x6   : > { %194 = sbr.rel (%p191_p2) target bundleno = 205 (0xcd), region = 36 }
   0xb   : > { %v799_v0 = vld [vmem:[%s978_s3 + $0x78] sm:$0xff]  ;;  %v798_v3 = vld [vmem:[%s978_s3 + $0x70] sm:$0xff]  ;;  %s982_s19 = smov (!%p222_p3, %s642_s19), 1  ;;  %v797_v6 = vld [vmem:[%s978_s3 + $0x68] sm:$0xff]  ;;  %vm256_vm0 = vcmask 1040384   ;;  %vm465_vm1 = vcmask 1046528  }
   0xc   : > { %v791_v1 = vld [vmem:[%s978_s3 + $0x38] sm:$0xff]  ;;  %371 = vmatpush.bf16.msra.mxu0 %v799_v0  ;;  %v790_v4 = vld [vmem:[%s978_s3 + $0x30] sm:$0xff]  ;;  %s782_s7 = sshll.u32 %s982_s19, 3  ;;  %v789_v7 = vld [vmem:[%s978_s3 + $0x28] sm:$0xff]  ;;  %vm309_vm2 = vsmask.f32 7424 }
   0xd   : > { %v807_v2 = vld [vmem:[%s978_s3 + $0xb8] sm:$0xff]  ;;  %434 = vmatpush.bf16.msra.mxu1 %v791_v1  ;;  %v806_v5 = vld [vmem:[%s978_s3 + $0xb0] sm:$0xff]  ;;  %s226_s10 = scalar_lea.vmem %s975_s0, %s782_s7  ;;  %v805_v8 = vld [vmem:[%s978_s3 + $0xa8] sm:$0xff]  ;;  %s231_s9 = scalar_lea.vmem %s979_s4, %s782_s7 }
   0xe   : > { %518 = vmatpush.bf16.msra.mxu2 %v807_v2  ;;  %v809_v9 = vld [vmem:[%s226_s10] sm:$0xff]   ;;  %v795_v21 = vld [vmem:[%s978_s3 + $0x58] sm:$0xff]  ;;  %v794_v28 = vld [vmem:[%s978_s3 + $0x50] sm:$0xff]  ;;  %s651_s10 = sshll.u32 %s982_s19, 1 }
   0xf   : > { %v825_v10 = vld [vmem:[%s976_s1] ss:$0 sm:$0xff]  ;;  %v810_v11 = vunpack.c.l.bf16 %v809_v9  ;;  %v811_v12 = vunpack.c.h.bf16 %v809_v9  ;;  %v787_v22 = vld [vmem:[%s978_s3 + $0x18] sm:$0xff]  ;;  %v786_v29 = vld [vmem:[%s978_s3 + $0x10] sm:$0xff]  ;;  %s235_s12 = scalar_lea.vmem %s980_s5, %s651_s10 }
  0x10   : > { %372 = vmatpush.bf16.msra.mxu0 %v798_v3  ;;  %v826_v13 = vld [vmem:[%s977_s2] ss:$0 sm:$0xff]  ;;  %v803_v23 = vld [vmem:[%s978_s3 + $0x98] sm:$0xff]  ;;  %v802_v30 = vld [vmem:[%s978_s3 + $0x90] sm:$0xff] }
  0x11   : > { %435 = vmatpush.bf16.msra.mxu1 %v790_v4  ;;  %v796_v14 = vld [vmem:[%s978_s3 + $0x60] sm:$0xff]  ;;  %v244_v17 = vmul.f32 %v825_v10, %v810_v11  ;;  %v245_v18 = vmul.f32 %v825_v10, %v811_v12  ;;  %v793_v37 = vld [vmem:[%s978_s3 + $0x48] sm:$0xff] }
  0x12   : > { %519 = vmatpush.bf16.msra.mxu2 %v806_v5  ;;  %v788_v15 = vld [vmem:[%s978_s3 + $0x20] sm:$0xff]  ;;  %v785_v38 = vld [vmem:[%s978_s3 + $0x8] sm:$0xff] }
  0x13   : > { %v804_v16 = vld [vmem:[%s978_s3 + $0xa0] sm:$0xff]  ;;  %v250_v19 = vadd.f32 %v826_v13, %v244_v17  ;;  %v251_v20 = vadd.f32 %v826_v13, %v245_v18  ;;  %v801_v42 = vld [vmem:[%s978_s3 + $0x88] sm:$0xff] }
  0x14   : > { %373 = vmatpush.bf16.msra.mxu0 %v797_v6  ;;  %v792_v45 = vld [vmem:[%s978_s3 + $0x40] sm:$0xff] }
  0x15   : > { %436 = vmatpush.bf16.msra.mxu1 %v789_v7  ;;  %v252_v24 = vmax.f32 %v250_v19, 0.0  ;;  %v253_v25 = vmax.f32 %v251_v20, 0.0  ;;  %v784_v46 = vld [vmem:[%s978_s3] sm:$0xff] }
  0x16   : > { %520 = vmatpush.bf16.msra.mxu2 %v805_v8  ;;  %v800_v50 = vld [vmem:[%s978_s3 + $0x80] sm:$0xff] }
  0x17   : > { %v257_v26 = vrot.slane %v252_v24, 7  ;;  %v258_v27 = vrot.slane %v253_v25, 7 }
  0x18   : > { %374 = vmatpush.bf16.msra.mxu0 %v796_v14 }
  0x19   : > { %437 = vmatpush.bf16.msra.mxu1 %v788_v15  ;;  %v259_v31 = vsel %vm256_vm0, %v257_v26, %v258_v27  ;;  %v263_v32 = vsel %vm256_vm0, 0.0, %v257_v26  ;;  %v264_v33 = vsel %vm256_vm0, %v258_v27, 0.0 }
  0x1a   : > { %521 = vmatpush.bf16.msra.mxu2 %v804_v16  ;;  %v265_v34 = vpack.c.bf16 %v263_v32, %v263_v32  ;;  %v266_v35 = vpack.c.bf16 %v259_v31, %v259_v31  ;;  %v267_v36 = vpack.c.bf16 %v264_v33, %v264_v33 }
  0x1c   : > { %375 = vmatpush.bf16.msra.mxu0 %v795_v21  ;;  %v304_v39 = vunpack.c.l.b16 %v265_v34  ;;  %v305_v40 = vunpack.c.l.b16 %v266_v35  ;;  %v306_v41 = vunpack.c.l.b16 %v267_v36 }
  0x1d   : > { %438 = vmatpush.bf16.msra.mxu1 %v787_v22 }
  0x1e   : > { %522 = vmatpush.bf16.msra.mxu2 %v803_v23  ;;  %v307_v43 = vpack.c.b16 %v305_v40, %v304_v39  ;;  %v308_v44 = vpack.c.b16 %v306_v41, %v306_v41 }
  0x20   : > { %376 = vmatpush.bf16.msra.mxu0 %v794_v28  ;;  %v311_v47 = vshrl.u32 %v307_v43, 16  ;;  %v313_v48 = vshll.u32 %v307_v43, 16  ;;  %v318_v49 = vshll.u32 %v308_v44, 16  ;;  %v466_v51 = vrot.slane %v307_v43, 1 }
  0x21   : > { %439 = vmatpush.bf16.msra.mxu1 %v786_v29  ;;  %v467_v52 = vrot.slane %v308_v44, 1 }
  0x22   : > { %523 = vmatpush.bf16.msra.mxu2 %v802_v30  ;;  %v315_v53 = vrot.slane %v313_v48, 1  ;;  %v320_v54 = vrot.slane %v318_v49, 1 }
  0x23   : > { %v468_v56 = vsel %vm465_vm1, %v466_v51, %v467_v52 }
  0x24   : > { %377 = vmatpush.bf16.msra.mxu0 %v793_v37  ;;  %v316_v55 = vor.u32 %v315_v53, %v311_v47 }
  0x25   : > { %440 = vmatpush.bf16.msra.mxu1 %v785_v38 }
  0x26   : > { %524 = vmatpush.bf16.msra.mxu2 %v801_v42  ;;  %v321_v57 = vsel %vm309_vm2, %v316_v55, %v320_v54 }
  0x28   : > { %378 = vmatpush.bf16.msra.mxu0 %v792_v45 }
  0x29   : > { %441 = vmatpush.bf16.msra.mxu1 %v784_v46 }
  0x2a   : > { %525 = vmatpush.bf16.msra.mxu2 %v800_v50 }
  0x2b   : > { %379 = vmatmul.bf16.vlgmr.msra.gmra.mxu0 %v321_v57 }
  0x2c   : > { %442 = vmatmul.bf16.vlgmr.msra.gmra.mxu1 %v307_v43 }
  0x2d   : > { %526 = vmatmul.bf16.vlgmr.msra.gmra.mxu2 %v468_v56 }
  0xa8   : > { %v380_v58 = vpop.f32.mrf.mxu0 }
  0xa9   : > { %v443_v59 = vpop.f32.mrf.mxu1 }
  0xaa   : > { %v444_v61 = vadd.f32 %v443_v59, %v380_v58 }
  0xb0   : > { %v527_v60 = vpop.f32.mrf.mxu2  ;;  %v382_v62 = vpop.f32.mrf.mxu0 }
  0xb1   : > { %v445_v63 = vpop.f32.mrf.mxu1  ;;  %v532_v0 = vadd.f32 %v527_v60, %v444_v61 }
  0xb2   : > { %v446_v1 = vadd.f32 %v445_v63, %v382_v62 }
  0xb3   : > { %v545_v4 = vmul.f32 %v532_v0, %v532_v0 }
  0xb8   : > { %v529_v2 = vpop.f32.mrf.mxu2 }
  0xb9   : > { %v533_v3 = vadd.f32 %v529_v2, %v446_v1 }
  0xbb   : > { %v815_v5 = vpack.c.bf16 %v533_v3, %v532_v0  ;;  %v538_v6 = vadd.f32 %v533_v3, %v532_v0  ;;  %v546_v7 = vmul.f32 %v533_v3, %v533_v3 }
  0xbd   : > { %816 = vst [vmem:[%s231_s9] sm:$0xff] %v815_v5   ;;  %v539_v8 = vrot.slane %v538_v6, 4  ;;  %v547_v9 = vadd.f32 %v546_v7, %v545_v4 }
  0xbf   : > { %v540_v10 = vadd.f32 %v539_v8, %v538_v6  ;;  %v548_v11 = vrot.slane %v547_v9, 4 }
  0xc1   : > { %v541_v12 = vrot.slane %v540_v10, 2  ;;  %v549_v13 = vadd.f32 %v548_v11, %v547_v9 }
  0xc3   : > { %v542_v14 = vadd.f32 %v541_v12, %v540_v10  ;;  %v550_v15 = vrot.slane %v549_v13, 2 }
  0xc5   : > { %v543_v16 = vrot.slane %v542_v14, 1  ;;  %v551_v17 = vadd.f32 %v550_v15, %v549_v13 }
  0xc7   : > { %v552_v18 = vrot.slane %v551_v17, 1  ;;  %v544_v19 = vadd.f32 %v543_v16, %v542_v14 }
  0xc9   : > { %v553_v20 = vadd.f32 %v552_v18, %v551_v17 }
  0xcb   : > { %v554_v21 = vsel %vm256_vm0, %v544_v19, %v553_v20 }
  0xcc   : > { %555 = vst [vmem:[%s235_s12] sm:$0x3] %v554_v21 }
  0xcd PF: > { %s16_s18 = sadd.s32 1, %s833_s18  }
  0xce   : > { %p13_p4 = scmp.ge.s32.totalorder %s16_s18, 4  }
  0xd0   :  { %15 = sbr.rel (!%p13_p4) target bundleno = 1 (0x1), region = 80 }

</bundles_post_ra>
